<compile_context>
chip_gen: v5e
topology: v5e:2x2
jax: 0.10.0
libtpu: 0.0.40
codegen_flags: <defaults>
</compile_context>

<pallas_src>
import functools

import jax
import jax.numpy as jnp
from jax.experimental import pallas as pl
from jax.experimental.pallas import tpu as pltpu

NEG_INF = -1e30
MAX_TILE = 2048   # pixels (lanes) processed per grid step
LANES = 128


def _round_up(x, m):
    return ((x + m - 1) // m) * m


def _focal_loss_kernel(preds_ref, labels_ref, alpha_ref, o_ref, *,
                       n_valid, gamma, tile, c_pad):
    i = pl.program_id(0)

    x = preds_ref[...]                                    # [c_pad, tile] f32
    # log_softmax over the class (sublane) axis; padded classes hold NEG_INF
    # so they vanish from the softmax denominator.
    m = jnp.max(x, axis=0, keepdims=True)                 # [1, tile]
    shifted = x - m
    denom = jnp.sum(jnp.exp(shifted), axis=0, keepdims=True)
    logsoft = shifted - jnp.log(denom)                    # [c_pad, tile]

    # one-hot "gather" of the label class via sublane-iota compare
    lbl = labels_ref[...]                                 # [1, tile] i32
    cls = jax.lax.broadcasted_iota(jnp.int32, (c_pad, tile), 0)
    onehot = (cls == lbl).astype(jnp.float32)             # [c_pad, tile]

    logp = jnp.sum(onehot * logsoft, axis=0, keepdims=True)    # [1, tile]
    p = jnp.exp(logp)
    alpha_i = jnp.sum(onehot * alpha_ref[...], axis=0, keepdims=True)

    # mask lanes that are padding (global pixel index >= n_valid)
    col = jax.lax.broadcasted_iota(jnp.int32, (1, tile), 1) + i * tile
    valid = (col < n_valid).astype(jnp.float32)

    one_minus_p = jnp.maximum(1.0 - p, 0.0)   # guard against fractional gamma
    loss = -alpha_i * (one_minus_p ** gamma) * logp * valid    # [1, tile]

    # vreg-aligned lane-group adds -> one lane-dense [1, 128] partial per tile
    partial = loss[:, 0:LANES]
    for g in range(1, tile // LANES):
        partial = partial + loss[:, g * LANES:(g + 1) * LANES]
    o_ref[...] = partial[None]                            # (1, 1, 128)


def focal_loss_pallas(preds_nchw, labels_bhw, alpha_vec, gamma=2,
                      size_average=True):
    B, C, H, W = preds_nchw.shape
    assert labels_bhw.shape == (B, H, W)
    assert alpha_vec.shape == (C,)

    N = B * H * W
    c_pad = max(8, _round_up(C, 8))            # classes on sublanes
    tile = min(MAX_TILE, _round_up(N, LANES))  # pixels per grid step
    n_pad = _round_up(N, tile)
    grid = n_pad // tile

    # NCHW -> [C, N] (classes x pixels); cheap pads only (C->c_pad, N->n_pad).
    x = jnp.transpose(preds_nchw.astype(jnp.float32), (1, 0, 2, 3)).reshape(C, N)
    x = jnp.pad(x, ((0, c_pad - C), (0, n_pad - N)), constant_values=NEG_INF)

    lbl = labels_bhw.reshape(1, N).astype(jnp.int32)
    lbl = jnp.pad(lbl, ((0, 0), (0, n_pad - N)))          # padded labels = 0

    alpha_col = jnp.pad(alpha_vec.astype(jnp.float32),
                        (0, c_pad - C)).reshape(c_pad, 1)

    kernel = functools.partial(_focal_loss_kernel, n_valid=N, gamma=gamma,
                               tile=tile, c_pad=c_pad)

    partials = pl.pallas_call(
        kernel,
        out_shape=jax.ShapeDtypeStruct((grid, 1, LANES), jnp.float32),
        grid_spec=pltpu.PrefetchScalarGridSpec(
            num_scalar_prefetch=0,
            grid=(grid,),
            in_specs=[
                pl.BlockSpec((c_pad, tile), lambda i: (0, i)),   # preds
                pl.BlockSpec((1, tile), lambda i: (0, i)),       # labels
                pl.BlockSpec((c_pad, 1), lambda i: (0, 0)),      # alpha
            ],
            out_specs=pl.BlockSpec((1, 1, LANES), lambda i: (i, 0, 0)),
        ),
        compiler_params=pltpu.CompilerParams(
            dimension_semantics=("parallel",)),
    )(x, lbl, alpha_col)

    total = jnp.sum(partials)
    if size_average:
        return total / jnp.float32(N)
    return total


def focal_loss_ref(preds_nchw, labels_bhw, alpha_vec, gamma=2,
                   size_average=True):
    """Pure-JAX reference mirroring the PyTorch module."""
    B, C, H, W = preds_nchw.shape
    x = jnp.transpose(preds_nchw, (0, 2, 3, 1)).reshape(-1, C)
    lbl = labels_bhw.reshape(-1)
    logsoft = jax.nn.log_softmax(x.astype(jnp.float32), axis=1)
    logp = jnp.take_along_axis(logsoft, lbl[:, None], axis=1)[:, 0]
    p = jnp.exp(logp)
    a = alpha_vec[lbl]
    loss = -a * ((1.0 - p) ** gamma) * logp
    return jnp.mean(loss) if size_average else jnp.sum(loss)


if __name__ == "__main__":
    num_classes = 3
    alpha = 0.25
    gamma = 2

    # deterministic alpha vector as in Focal_loss.__init__ (scalar-alpha branch)
    alpha_vec = jnp.zeros((num_classes,), jnp.float32)
    alpha_vec = alpha_vec.at[0].set(alpha).at[1:].set(1.0 - alpha)

    key = jax.random.PRNGKey(0)
    k1, k2 = jax.random.split(key)
    B, C, H, W = 2, num_classes, 16, 16
    preds = jax.random.normal(k1, (B, C, H, W), dtype=jnp.float32)
    labels = jax.random.randint(k2, (B, H, W), 0, num_classes, dtype=jnp.int32)

    out = focal_loss_pallas(preds, labels, alpha_vec, gamma=gamma,
                            size_average=True)
    out = jax.block_until_ready(out)

    ref = focal_loss_ref(preds, labels, alpha_vec, gamma=gamma,
                         size_average=True)
    assert jnp.allclose(out, ref, rtol=1e-5, atol=1e-5), (out, ref)

    print("KERNEL_OK")
</pallas_src>

<mosaic_0001>
module attributes {stable_mosaic.version = 11 : i64} {
  func.func @_focal_loss_kernel(%arg0: i32, %arg1: memref<8x512xf32, #tpu.memory_space<vmem>>, %arg2: memref<1x512xi32, #tpu.memory_space<vmem>>, %arg3: memref<8x1xf32, #tpu.memory_space<vmem>>, %arg4: memref<1x1x128xf32, #tpu.memory_space<vmem>>) attributes {dimension_semantics = [#tpu.dimension_semantics<parallel>], iteration_bounds = array<i64: 1>, scalar_prefetch = 0 : i64, scratch_operands = 0 : i64, tpu.core_type = #tpu.core_type<tc>, window_params = [{transform_indices = @transform_0, window_bounds = array<i64: 8, 512>}, {transform_indices = @transform_1, window_bounds = array<i64: 1, 512>}, {pipeline_mode = #tpu.pipeline_mode<synchronous>, transform_indices = @transform_2, window_bounds = array<i64: 8, 1>}, {transform_indices = @transform_3, window_bounds = array<i64: 1, 1, 128>}]} {
    %c0 = arith.constant 0 : index
    %c0_0 = arith.constant 0 : index
    %0 = vector.load %arg1[%c0, %c0_0] : memref<8x512xf32, #tpu.memory_space<vmem>>, vector<8x512xf32>
    %cst = arith.constant dense<0xFF800000> : vector<512xf32>
    %1 = vector.multi_reduction <maximumf>, %0, %cst [0] : vector<8x512xf32> to vector<512xf32>
    %2 = vector.shape_cast %1 : vector<512xf32> to vector<1x512xf32>
    %3 = vector.broadcast %2 : vector<1x512xf32> to vector<8x512xf32>
    %4 = arith.subf %0, %3 : vector<8x512xf32>
    %5 = math.exp %4 : vector<8x512xf32>
    %cst_1 = arith.constant dense<0.000000e+00> : vector<512xf32>
    %6 = vector.multi_reduction <add>, %5, %cst_1 [0] : vector<8x512xf32> to vector<512xf32>
    %7 = vector.shape_cast %6 : vector<512xf32> to vector<1x512xf32>
    %8 = math.log %7 : vector<1x512xf32>
    %9 = vector.broadcast %8 : vector<1x512xf32> to vector<8x512xf32>
    %10 = arith.subf %4, %9 : vector<8x512xf32>
    %c0_2 = arith.constant 0 : index
    %c0_3 = arith.constant 0 : index
    %11 = vector.load %arg2[%c0_2, %c0_3] : memref<1x512xi32, #tpu.memory_space<vmem>>, vector<1x512xi32>
    %12 = tpu.iota {dimensions = array<i32: 0>} : vector<8x512xi32>
    %13 = vector.broadcast %11 : vector<1x512xi32> to vector<8x512xi32>
    %14 = arith.cmpi eq, %12, %13 : vector<8x512xi32>
    %15 = arith.extui %14 : vector<8x512xi1> to vector<8x512xi32>
    %16 = arith.sitofp %15 : vector<8x512xi32> to vector<8x512xf32>
    %17 = arith.mulf %16, %10 : vector<8x512xf32>
    %cst_4 = arith.constant dense<0.000000e+00> : vector<512xf32>
    %18 = vector.multi_reduction <add>, %17, %cst_4 [0] : vector<8x512xf32> to vector<512xf32>
    %19 = vector.shape_cast %18 : vector<512xf32> to vector<1x512xf32>
    %20 = math.exp %19 : vector<1x512xf32>
    %c0_5 = arith.constant 0 : index
    %c0_6 = arith.constant 0 : index
    %21 = vector.load %arg3[%c0_5, %c0_6] : memref<8x1xf32, #tpu.memory_space<vmem>>, vector<8x1xf32>
    %22 = vector.broadcast %21 : vector<8x1xf32> to vector<8x512xf32>
    %23 = arith.mulf %16, %22 : vector<8x512xf32>
    %cst_7 = arith.constant dense<0.000000e+00> : vector<512xf32>
    %24 = vector.multi_reduction <add>, %23, %cst_7 [0] : vector<8x512xf32> to vector<512xf32>
    %25 = vector.shape_cast %24 : vector<512xf32> to vector<1x512xf32>
    %26 = tpu.iota {dimensions = array<i32: 1>} : vector<1x512xi32>
    %c512_i32 = arith.constant 512 : i32
    %27 = arith.muli %arg0, %c512_i32 : i32
    %28 = vector.broadcast %27 : i32 to vector<1x512xi32>
    %29 = arith.addi %26, %28 : vector<1x512xi32>
    %c512_i32_8 = arith.constant 512 : i32
    %30 = vector.broadcast %c512_i32_8 : i32 to vector<1x512xi32>
    %31 = arith.cmpi slt, %29, %30 : vector<1x512xi32>
    %32 = arith.extui %31 : vector<1x512xi1> to vector<1x512xi32>
    %33 = arith.sitofp %32 : vector<1x512xi32> to vector<1x512xf32>
    %cst_9 = arith.constant 1.000000e+00 : f32
    %34 = vector.broadcast %cst_9 : f32 to vector<1x512xf32>
    %35 = arith.subf %34, %20 : vector<1x512xf32>
    %cst_10 = arith.constant 0.000000e+00 : f32
    %36 = vector.broadcast %cst_10 : f32 to vector<1x512xf32>
    %37 = arith.maximumf %35, %36 : vector<1x512xf32>
    %cst_11 = arith.constant 0.000000e+00 : f32
    %38 = vector.broadcast %cst_11 : f32 to vector<1x512xf32>
    %39 = arith.subf %38, %25 : vector<1x512xf32>
    %40 = arith.mulf %37, %37 : vector<1x512xf32>
    %41 = arith.mulf %39, %40 : vector<1x512xf32>
    %42 = arith.mulf %41, %19 : vector<1x512xf32>
    %43 = arith.mulf %42, %33 : vector<1x512xf32>
    %44 = vector.extract_strided_slice %43 {offsets = [0, 0], sizes = [1, 128], strides = [1, 1]} : vector<1x512xf32> to vector<1x128xf32>
    %45 = vector.extract_strided_slice %43 {offsets = [0, 128], sizes = [1, 128], strides = [1, 1]} : vector<1x512xf32> to vector<1x128xf32>
    %46 = arith.addf %44, %45 : vector<1x128xf32>
    %47 = vector.extract_strided_slice %43 {offsets = [0, 256], sizes = [1, 128], strides = [1, 1]} : vector<1x512xf32> to vector<1x128xf32>
    %48 = arith.addf %46, %47 : vector<1x128xf32>
    %49 = vector.extract_strided_slice %43 {offsets = [0, 384], sizes = [1, 128], strides = [1, 1]} : vector<1x512xf32> to vector<1x128xf32>
    %50 = arith.addf %48, %49 : vector<1x128xf32>
    %51 = vector.shape_cast %50 : vector<1x128xf32> to vector<1x1x128xf32>
    %c0_12 = arith.constant 0 : index
    %c0_13 = arith.constant 0 : index
    %c0_14 = arith.constant 0 : index
    %52 = vector.load %arg4[%c0_12, %c0_13, %c0_14] : memref<1x1x128xf32, #tpu.memory_space<vmem>>, vector<1x1x128xf32>
    tpu.vector_store %arg4[%c0_12, %c0_13, %c0_14], %51 {strides = array<i32>} : memref<1x1x128xf32, #tpu.memory_space<vmem>>, vector<1x1x128xf32>,
    return
  }
  func.func @transform_0(%arg0: i32) -> (i32, i32) {
    %c0_i32 = arith.constant 0 : i32
    %c0_i32_0 = arith.constant 0 : i32
    return %c0_i32, %arg0 : i32, i32
  }
  func.func @transform_1(%arg0: i32) -> (i32, i32) {
    %c0_i32 = arith.constant 0 : i32
    %c0_i32_0 = arith.constant 0 : i32
    return %c0_i32, %arg0 : i32, i32
  }
  func.func @transform_2(%arg0: i32) -> (i32, i32) {
    %c0_i32 = arith.constant 0 : i32
    %c0_i32_0 = arith.constant 0 : i32
    %c0_i32_1 = arith.constant 0 : i32
    return %c0_i32, %c0_i32_0 : i32, i32
  }
  func.func @transform_3(%arg0: i32) -> (i32, i32, i32) {
    %c0_i32 = arith.constant 0 : i32
    %c0_i32_0 = arith.constant 0 : i32
    %c0_i32_1 = arith.constant 0 : i32
    return %arg0, %c0_i32, %c0_i32_0 : i32, i32, i32
  }
}

</mosaic_0001>

<bundles_post_ra>
// kernel: tpu_custom_call.1
= control target key start
LH: loop header
LB: loop body
LE: loop exit
PB: predicated region body
PF: predicated region fallthrough
CT: control target
= control target key end

     0   :  { %8 = vsyncpa [#allocation3], 0  ;;  %s419_s0 = inlined_call_operand.hbm [shape: f32[8,512], index: 0, kind: input, shape index: {}]   ;;  %s420_s1 = inlined_call_operand.vmem [shape: s32[1,512], index: 1, kind: input, shape index: {}]   ;;  %s421_s2 = inlined_call_operand.vmem [shape: f32[8,1], index: 2, kind: input, shape index: {}]   ;;  %s422_s3 = inlined_call_operand.hbm [shape: f32[1,1,128], index: 3, kind: output, shape index: {}]  }
   0x1   :  { %9 = vsyncpa [#allocation4], 0  ;;  %s15_s14 = sshll.u32 %s419_s0, 4  ;;  %s351_s15 = smov [#allocation2]   ;;  %s16_s14 = int_to_ptr.hbm [resolvable:$true] %s15_s14 }
   0x2   :  { %s17_s16 = sshll.u32 %s351_s15, 4  ;;  %s18_s16 = int_to_ptr.vmem [resolvable:$true] %s17_s16 }
   0x3   :  { %20 = dma.hbm_to_vmem [thread:$0]  %s16_s14, 512, %s18_s16, [#allocation3]  }
   0x4   :  { %347 = dma.done.wait [#allocation3], 512  }
   0x5   :  { %348 = vsyncadd [#allocation3], 4294966784  ;;  %v352_v0 = vmov 0   ;;  %v160_v1 = vld [vmem:[%s421_s2] sm:$0xff]  ;;  %v30_v3 = vld [vmem:[#allocation2 + $0x8] sm:$0xff]  ;;  %s256_s22 = sshll.u32 %s422_s3, 4  ;;  %s257_s22 = int_to_ptr.hbm [resolvable:$true] %s256_s22 }
   0x6   :  { %274 = vset.pattern.permute.xlu0 %v352_v0  ;;  %v29_v2 = vld [vmem:[#allocation2] sm:$0xff]  ;;  %v31_v4 = vld [vmem:[#allocation2 + $0x10] sm:$0xff]  ;;  %v32_v5 = vld [vmem:[#allocation2 + $0x18] sm:$0xff]  ;;  %v39_v7 = vrot.slane %v30_v3, 4 }
   0x7   :  { %163 = vperm.xlu0 %274, %v160_v1   ;;  %v33_v6 = vrot.slane %v29_v2, 4  ;;  %v45_v8 = vrot.slane %v31_v4, 4  ;;  %v51_v9 = vrot.slane %v32_v5, 4 }
   0x8   :  { %v40_v11 = vmax.f32 %v30_v3, %v39_v7 }
   0x9   :  { %v34_v10 = vmax.f32 %v29_v2, %v33_v6  ;;  %v46_v12 = vmax.f32 %v31_v4, %v45_v8  ;;  %v52_v13 = vmax.f32 %v32_v5, %v51_v9 }
   0xa   :  { %v41_v15 = vrot.slane %v40_v11, 2 }
   0xb   :  { %v35_v14 = vrot.slane %v34_v10, 2  ;;  %v47_v16 = vrot.slane %v46_v12, 2  ;;  %v53_v17 = vrot.slane %v52_v13, 2 }
   0xc   :  { %v42_v19 = vmax.f32 %v40_v11, %v41_v15 }
   0xd   :  { %v36_v18 = vmax.f32 %v34_v10, %v35_v14  ;;  %v48_v20 = vmax.f32 %v46_v12, %v47_v16  ;;  %v54_v21 = vmax.f32 %v52_v13, %v53_v17 }
   0xe   :  { %v43_v23 = vrot.slane %v42_v19, 1 }
   0xf   :  { %v37_v22 = vrot.slane %v36_v18, 1  ;;  %v49_v24 = vrot.slane %v48_v20, 1  ;;  %v55_v25 = vrot.slane %v54_v21, 1 }
  0x10   :  { %v44_v27 = vmax.f32 %v42_v19, %v43_v23  ;;  %v353_v19 = vmov 0.0  }
  0x11   :  { %v38_v26 = vmax.f32 %v36_v18, %v37_v22  ;;  %v50_v28 = vmax.f32 %v48_v20, %v49_v24  ;;  %v56_v29 = vmax.f32 %v54_v21, %v55_v25 }
  0x12   :  { %v383_v31 = vsub.f32 %v30_v3, %v44_v27 }
  0x13   :  { %v381_v30 = vsub.f32 %v29_v2, %v38_v26  ;;  %v385_v32 = vsub.f32 %v31_v4, %v50_v28  ;;  %v387_v33 = vsub.f32 %v32_v5, %v56_v29  ;;  %v106_v2 = vlaneseq  ;;  %v105_v5 = vld [vmem:[%s420_s1] sm:$0xf]  ;;  %s354_s1 = smov [#allocation5]  }
  0x14   :  { %v63_v35 = vmul.f32 1.442695, %v383_v31  ;;  %v108_v7 = vperm.slane %v105_v5, 0  ;;  %v109_v8 = vperm.slane %v105_v5, 1  ;;  %v110_v11 = vperm.slane %v105_v5, 2  ;;  %s254_s19 = sshll.u32 %s354_s1, 4  ;;  %s255_s19 = int_to_ptr.vmem [resolvable:$true] %s254_s19 }
  0x15   :  { %v61_v34 = vmul.f32 1.442695, %v381_v30  ;;  %v65_v36 = vmul.f32 1.442695, %v385_v32  ;;  %v67_v37 = vmul.f32 1.442695, %v387_v33 }
  0x16   :  { %v107_v4 = vshrl.u32 %v106_v2, 7  ;;  %v111_v15 = vperm.slane %v105_v5, 3 }
  0x17   :  { %275 = vpow2.f32 %v61_v34 }
  0x18   :  { %277 = vpow2.f32 %v63_v35  ;;  %vm112_vm0 = vcmp.eq.s32.totalorder %v107_v4, %v108_v7  ;;  %vm113_vm1 = vcmp.eq.s32.totalorder %v107_v4, %v109_v8  ;;  %vm114_vm2 = vcmp.eq.s32.totalorder %v107_v4, %v110_v11 }
  0x19   :  { %279 = vpow2.f32 %v65_v36  ;;  %v266_v20 = vsel %vm112_vm0, 1.0, %v353_v19  ;;  %vm115_vm3 = vcmp.eq.s32.totalorder %v107_v4, %v111_v15  ;;  %v267_v22 = vsel %vm113_vm1, 1.0, %v353_v19 }
  0x1a   :  { %281 = vpow2.f32 %v67_v37  ;;  %v268_v23 = vsel %vm114_vm2, 1.0, %v353_v19  ;;  %v269_v26 = vsel %vm115_vm3, 1.0, %v353_v19 }
  0x1d   :  { %v276_v38 = vpop.eup %275 }
  0x1e   :  { %v278_v39 = vpop.eup %277  ;;  %v69_v40 = vrot.slane %v276_v38, 4 }
  0x1f   :  { %v280_v41 = vpop.eup %279  ;;  %v75_v42 = vrot.slane %v278_v39, 4 }
  0x20   :  { %v282_v43 = vpop.eup %281  ;;  %v70_v44 = vadd.f32 %v276_v38, %v69_v40  ;;  %v81_v45 = vrot.slane %v280_v41, 4 }
  0x21   :  { %v76_v46 = vadd.f32 %v278_v39, %v75_v42  ;;  %v87_v47 = vrot.slane %v282_v43, 4 }
  0x22   :  { %v71_v48 = vrot.slane %v70_v44, 2  ;;  %v82_v49 = vadd.f32 %v280_v41, %v81_v45 }
  0x23   :  { %v77_v50 = vrot.slane %v76_v46, 2  ;;  %v88_v51 = vadd.f32 %v282_v43, %v87_v47 }
  0x24   :  { %v72_v52 = vadd.f32 %v71_v48, %v70_v44  ;;  %v83_v53 = vrot.slane %v82_v49, 2 }
  0x25   :  { %v78_v54 = vadd.f32 %v77_v50, %v76_v46  ;;  %v89_v55 = vrot.slane %v88_v51, 2 }
  0x26   :  { %v73_v56 = vrot.slane %v72_v52, 1  ;;  %v84_v57 = vadd.f32 %v83_v53, %v82_v49 }
  0x27   :  { %v79_v58 = vrot.slane %v78_v54, 1  ;;  %v90_v59 = vadd.f32 %v89_v55, %v88_v51 }
  0x28   :  { %v74_v60 = vadd.f32 %v73_v56, %v72_v52  ;;  %v85_v61 = vrot.slane %v84_v57, 1 }
  0x29   :  { %v80_v62 = vadd.f32 %v79_v58, %v78_v54  ;;  %v91_v63 = vrot.slane %v90_v59, 1 }
  0x2a   :  { %v86_v0 = vadd.f32 %v85_v61, %v84_v57  ;;  %283 = vlog2.f32 %v74_v60 }
  0x2b   :  { %v92_v1 = vadd.f32 %v91_v63, %v90_v59  ;;  %285 = vlog2.f32 %v80_v62 }
  0x2c   :  { %287 = vlog2.f32 %v86_v0 }
  0x2d   :  { %289 = vlog2.f32 %v92_v1 }
  0x30   :  { %v284_v3 = vpop.eup %283 }
  0x31   :  { %v286_v6 = vpop.eup %285  ;;  %v94_v10 = vmul.f32 0.6931472, %v284_v3 }
  0x32   :  { %v288_v9 = vpop.eup %287  ;;  %v96_v13 = vmul.f32 0.6931472, %v286_v6 }
  0x33   :  { %v290_v12 = vpop.eup %289  ;;  %v98_v14 = vmul.f32 0.6931472, %v288_v9  ;;  %v101_v17 = vsub.f32 %v381_v30, %v94_v10 }
  0x34   :  { %v100_v16 = vmul.f32 0.6931472, %v290_v12  ;;  %v102_v18 = vsub.f32 %v383_v31, %v96_v13 }
  0x35   :  { %v103_v21 = vsub.f32 %v385_v32, %v98_v14  ;;  %v124_v25 = vmul.f32 %v266_v20, %v101_v17 }
  0x36   :  { %v104_v24 = vsub.f32 %v387_v33, %v100_v16  ;;  %v125_v27 = vmul.f32 %v267_v22, %v102_v18 }
  0x37   :  { %v126_v28 = vmul.f32 %v268_v23, %v103_v21  ;;  %v128_v34 = vrot.slane %v124_v25, 4 }
  0x38   :  { %v127_v29 = vmul.f32 %v269_v26, %v104_v24  ;;  %v134_v35 = vrot.slane %v125_v27, 4 }
  0x39   :  { %v140_v30 = vrot.slane %v126_v28, 4  ;;  %v129_v36 = vadd.f32 %v128_v34, %v124_v25 }
  0x3a   :  { %v146_v37 = vrot.slane %v127_v29, 4  ;;  %v135_v31 = vadd.f32 %v134_v35, %v125_v27 }
  0x3b   :  { %v141_v38 = vadd.f32 %v140_v30, %v126_v28  ;;  %v130_v39 = vrot.slane %v129_v36, 2 }
  0x3c   :  { %v147_v40 = vadd.f32 %v146_v37, %v127_v29  ;;  %v136_v32 = vrot.slane %v135_v31, 2 }
  0x3d   :  { %v142_v41 = vrot.slane %v141_v38, 2  ;;  %v131_v42 = vadd.f32 %v130_v39, %v129_v36 }
  0x3e   :  { %v148_v43 = vrot.slane %v147_v40, 2  ;;  %v137_v44 = vadd.f32 %v136_v32, %v135_v31 }
  0x3f   :  { %v143_v33 = vadd.f32 %v142_v41, %v141_v38  ;;  %v132_v45 = vrot.slane %v131_v42, 1 }
  0x40   :  { %v149_v46 = vadd.f32 %v148_v43, %v147_v40  ;;  %v138_v47 = vrot.slane %v137_v44, 1 }
  0x41   :  { %v144_v48 = vrot.slane %v143_v33, 1  ;;  %v400_v49 = vadd.f32 %v132_v45, %v131_v42 }
  0x42   :  { %v150_v50 = vrot.slane %v149_v46, 1  ;;  %v402_v51 = vadd.f32 %v138_v47, %v137_v44 }
  0x43   :  { %v404_v52 = vadd.f32 %v144_v48, %v143_v33  ;;  %v152_v53 = vmul.f32 1.442695, %v400_v49 }
  0x44   :  { %v407_v54 = vadd.f32 %v150_v50, %v149_v46  ;;  %v154_v55 = vmul.f32 1.442695, %v402_v51 }
  0x45   :  { %v156_v56 = vmul.f32 1.442695, %v404_v52  ;;  %291 = vpow2.f32 %v152_v53 }
  0x46   :  { %v158_v57 = vmul.f32 1.442695, %v407_v54  ;;  %293 = vpow2.f32 %v154_v55 }
  0x47   :  { %295 = vpow2.f32 %v156_v56 }
  0x48   :  { %297 = vpow2.f32 %v158_v57 }
  0x4b   :  { %v292_v58 = vpop.eup %291 }
  0x4c   :  { %v294_v59 = vpop.eup %293  ;;  %v217_v7 = vsub.f32 1.0, %v292_v58 }
  0x4d   :  { %v296_v61 = vpop.eup %295  ;;  %v218_v8 = vsub.f32 1.0, %v294_v59 }
  0x4e   :  { %v298_v2 = vpop.eup %297  ;;  %v219_v9 = vsub.f32 1.0, %v296_v61  ;;  %v221_v19 = vmax.f32 %v217_v7, 0.0 }
  0x4f   :  { %v220_v14 = vsub.f32 1.0, %v298_v2 }
  0x50   :  { %v223_v21 = vmax.f32 %v219_v9, 0.0  ;;  %v229_v35 = vmul.f32 %v221_v19, %v221_v19 }
  0x52   :  { %v231_v36 = vmul.f32 %v223_v21, %v223_v21 }
  0x79   :  { %v164_v60 = vpop.permute.xlu0 %163 }
  0x7a   :  { %v166_v62 = vmul.f32 %v266_v20, %v164_v60  ;;  %v167_v63 = vmul.f32 %v267_v22, %v164_v60  ;;  %v168_v0 = vmul.f32 %v268_v23, %v164_v60  ;;  %v169_v1 = vmul.f32 %v269_v26, %v164_v60 }
  0x7b   :  { %v222_v20 = vmax.f32 %v218_v8, 0.0  ;;  %v224_v26 = vmax.f32 %v220_v14, 0.0 }
  0x7c   :  { %v170_v3 = vrot.slane %v166_v62, 4  ;;  %v176_v4 = vrot.slane %v167_v63, 4  ;;  %v182_v5 = vrot.slane %v168_v0, 4  ;;  %v188_v6 = vrot.slane %v169_v1, 4 }
  0x7d   :  { %v230_v30 = vmul.f32 %v222_v20, %v222_v20  ;;  %v232_v40 = vmul.f32 %v224_v26, %v224_v26 }
  0x7e   :  { %v171_v10 = vadd.f32 %v170_v3, %v166_v62  ;;  %v177_v11 = vadd.f32 %v176_v4, %v167_v63  ;;  %v183_v12 = vadd.f32 %v182_v5, %v168_v0  ;;  %v189_v13 = vadd.f32 %v188_v6, %v169_v1 }
  0x80   :  { %v172_v15 = vrot.slane %v171_v10, 2  ;;  %v178_v16 = vrot.slane %v177_v11, 2  ;;  %v184_v17 = vrot.slane %v183_v12, 2  ;;  %v190_v18 = vrot.slane %v189_v13, 2 }
  0x82   :  { %v173_v22 = vadd.f32 %v172_v15, %v171_v10  ;;  %v179_v23 = vadd.f32 %v178_v16, %v177_v11  ;;  %v185_v24 = vadd.f32 %v184_v17, %v183_v12  ;;  %v191_v25 = vadd.f32 %v190_v18, %v189_v13 }
  0x84   :  { %v174_v27 = vrot.slane %v173_v22, 1  ;;  %v180_v28 = vrot.slane %v179_v23, 1  ;;  %v186_v29 = vrot.slane %v185_v24, 1  ;;  %v192_v34 = vrot.slane %v191_v25, 1 }
  0x86   :  { %v175_v37 = vadd.f32 %v174_v27, %v173_v22  ;;  %v181_v31 = vadd.f32 %v180_v28, %v179_v23  ;;  %v187_v38 = vadd.f32 %v186_v29, %v185_v24  ;;  %v193_v39 = vadd.f32 %v192_v34, %v191_v25 }
  0x88   :  { %v225_v32 = vsub.f32 0.0, %v175_v37  ;;  %v226_v41 = vsub.f32 0.0, %v181_v31  ;;  %v227_v42 = vsub.f32 0.0, %v187_v38  ;;  %v228_v43 = vsub.f32 0.0, %v193_v39 }
  0x8a   :  { %v233_v44 = vmul.f32 %v229_v35, %v225_v32  ;;  %v234_v33 = vmul.f32 %v230_v30, %v226_v41  ;;  %v235_v45 = vmul.f32 %v231_v36, %v227_v42  ;;  %v236_v46 = vmul.f32 %v232_v40, %v228_v43 }
  0x8c   :  { %v237_v47 = vmul.f32 %v233_v44, %v400_v49  ;;  %v238_v48 = vmul.f32 %v234_v33, %v402_v51  ;;  %v239_v50 = vmul.f32 %v235_v45, %v404_v52  ;;  %v240_v55 = vmul.f32 %v236_v46, %v407_v54 }
  0x8e   :  { %v245_v53 = vadd.f32 %v238_v48, %v237_v47 }
  0x90   :  { %v246_v56 = vadd.f32 %v245_v53, %v239_v50 }
  0x92   :  { %v247_v57 = vadd.f32 %v246_v56, %v240_v55 }
  0x94   :  { %248 = vst [vmem:[#allocation5] sm:$0x1] %v247_v57 }
  0x95   :  { %259 = dma.vmem_to_hbm [thread:$0]  %s255_s19, 16, %s257_s22, [#allocation4]  }
  0x96   :  { %349 = dma.done.wait [#allocation4], 16  }
  0x97   :  { %350 = vsyncadd [#allocation4], 4294967280 }
  0x98   :  { %264 = vsyncpa [#allocation3], 1 }
  0x99   :  { %265 = vsyncpa [#allocation4], 1 }

</bundles_post_ra>
